<compile_context>
chip_gen: v7x
topology: tpu7x:2x2x1
jax: 0.10.0
libtpu: 0.0.40
codegen_flags: <defaults>
</compile_context>

<pallas_src>
import functools

import jax
import jax.numpy as jnp
from jax.experimental import pallas as pl
from jax.experimental.pallas import tpu as pltpu

_LANE = 128
_SUB = 8
_CANONICAL = ("cross_entropy", "cluster", "separation", "l1")


def _cdiv(a, b):
    return -(-a // b)


def _round_up(a, b):
    return _cdiv(a, b) * b


# ------------------------------ fused kernel --------------------------------

def _fused_loss_kernel(
    logits_ref, target_ref, dist_ref, ident_ref, w_ref, l1m_ref,   # inputs
    out_ref,                                                       # (1, 8, 128) slab
    ce_acc, clst_acc, sep_acc,                                     # (tb, 1) VMEM scratch
    *, inv_n, coefs, tiles_per_core, n_actual, mask_rows):
    """One batch tile per grid step; per-row accumulation each step, single
    cross-sublane reduction + masked-L1 + coefficient combine in finalize."""
    core = pl.program_id(0)
    step = pl.program_id(1)

    @pl.when(step == 0)
    def _init():
        ce_acc[...] = jnp.zeros_like(ce_acc)
        clst_acc[...] = jnp.zeros_like(clst_acc)
        sep_acc[...] = jnp.zeros_like(sep_acc)

    # ---- cross entropy (per-row) -------------------------------------------
    logits = logits_ref[...].astype(jnp.float32)                  # (TB, C)
    tgt = target_ref[...]                                         # (TB, 1) int32
    tb, c = logits.shape

    cls_ids = jax.lax.broadcasted_iota(jnp.int32, (tb, c), 1)
    onehot = (cls_ids == tgt).astype(jnp.float32)                 # (TB, C) reused below

    m = jnp.max(logits, axis=-1, keepdims=True)
    lse = m + jnp.log(jnp.sum(jnp.exp(logits - m), axis=-1, keepdims=True))
    true_logit = jnp.sum(logits * onehot, axis=-1, keepdims=True)
    ce_row = lse - true_logit                                     # (TB, 1)

    # ---- cluster + separation; same-class mask derived on the MXU ----------
    ident = ident_ref[...].astype(jnp.float32)                    # (C, P) resident
    same = jnp.dot(onehot, ident, preferred_element_type=jnp.float32)  # (TB, P), exact 0/1
    is_same = same > 0.5

    d = dist_ref[...].astype(jnp.float32)                         # (TB, P)
    big = jnp.float32(1e9)
    # NOTE: ProtoPNet guarantees every sample has >=1 same-class AND >=1
    # other-class prototype; otherwise the 1e9 sentinel would leak into the
    # cluster / separation means respectively.
    clst_row = jnp.min(jnp.where(is_same, d, big), axis=-1, keepdims=True)
    sep_row = jnp.min(jnp.where(is_same, big, d), axis=-1, keepdims=True)

    if mask_rows:  # batch was padded up to the tile grid: zero padded rows
        row0 = (core * tiles_per_core + step) * tb
        row_ids = row0 + jax.lax.broadcasted_iota(jnp.int32, (tb, 1), 0)
        valid = (row_ids < n_actual).astype(jnp.float32)
        ce_row = ce_row * valid
        clst_row = clst_row * valid
        sep_row = sep_row * valid

    # per-row accumulation: plain VPU adds; cross-sublane reduce only once below
    ce_acc[...] += ce_row
    clst_acc[...] += clst_row
    sep_acc[...] += sep_row

    # ---- finalize: reduce, masked L1, coefficient combine, lane-dense store --
    @pl.when(step == pl.num_programs(1) - 1)
    def _finalize():
        ce = jnp.sum(ce_acc[...], axis=0, keepdims=True) * jnp.float32(inv_n)
        clst = jnp.sum(clst_acc[...], axis=0, keepdims=True) * jnp.float32(inv_n)
        sep = jnp.sum(sep_acc[...], axis=0, keepdims=True) * jnp.float32(inv_n)

        w = w_ref[...].astype(jnp.float32)                        # (C, P) resident
        lm = l1m_ref[...].astype(jnp.float32)                     # (C, P) resident
        l1 = jnp.sum(jnp.sum(jnp.abs(w * lm), axis=-1, keepdims=True),
                     axis=0, keepdims=True)                       # (1, 1)
        # the batch-independent L1 term is counted once (core 0 only)
        l1 = l1 * (core == 0).astype(jnp.float32)

        scaled = (ce * jnp.float32(coefs[0]),
                  clst * jnp.float32(coefs[1]),
                  sep * jnp.float32(coefs[2]),
                  l1 * jnp.float32(coefs[3]))
        total = scaled[0] + scaled[1] + scaled[2] + scaled[3]     # (1, 1)

        rows8 = jax.lax.broadcasted_iota(jnp.int32, (_SUB, _LANE), 0)
        lanes = jax.lax.broadcasted_iota(jnp.int32, (_SUB, _LANE), 1)
        at_row0 = rows8 == 0
        slab = jnp.where(at_row0 & (lanes == 0), total, jnp.float32(0.0))
        for idx, s in enumerate(scaled):
            slab = jnp.where(at_row0 & (lanes == (idx + 1)), s, slab)
        out_ref[...] = slab[None]                                 # (1, 8, 128) unmasked store


# ---------------------------- pallas_call wrapper ----------------------------

def _fused_loss_call(logits, target, min_distances, proto_class_identity,
                     last_layer_weight, l1_mask, coefs, *,
                     num_cores=2, vmem_budget_bytes=12 * 1024 * 1024,
                     max_batch_tile=1024):
    n, c = logits.shape
    _, p = min_distances.shape
    cw, pw = last_layer_weight.shape

    # ---- core split (v7x has 2 TCs; harmless on 1-TC chips) -----------------
    ncores = max(1, min(int(num_cores), n // 8))
    rows_per_core = _cdiv(n, ncores)

    # ---- VMEM-budgeted batch tile -------------------------------------------
    logit_isz = jnp.dtype(logits.dtype).itemsize
    dist_isz = jnp.dtype(min_distances.dtype).itemsize
    # double-buffered batch-tiled blocks + lane-padded target block + scratch
    per_row_bytes = 2 * (c * logit_isz + p * dist_isz + _LANE * 4) + 3 * _LANE * 4
    resident_bytes = 2 * 3 * cw * pw * 4 + 64 * 1024
    budget = max(int(vmem_budget_bytes) - resident_bytes, 8 * per_row_bytes)
    tb = min(int(max_batch_tile), budget // per_row_bytes, _round_up(rows_per_core, 8))
    tb = max(8, (tb // 8) * 8)

    tiles_per_core = _cdiv(rows_per_core, tb)
    n_pad = ncores * tiles_per_core * tb
    grid = (ncores, tiles_per_core)

    # ---- pad batch dim if needed (masked in-kernel) --------------------------
    def _pad_rows(x):
        if x.shape[0] == n_pad:
            return x
        return jnp.pad(x, ((0, n_pad - x.shape[0]),) + ((0, 0),) * (x.ndim - 1))

    logits_p = _pad_rows(logits)
    dist_p = _pad_rows(min_distances)
    tgt_p = _pad_rows(jnp.asarray(target, jnp.int32).reshape(n, 1))

    row_map = lambda co, i: (co * tiles_per_core + i, 0)
    resident_map = lambda co, i: (0, 0)

    kernel = functools.partial(
        _fused_loss_kernel,
        inv_n=1.0 / float(n),
        coefs=tuple(float(x) for x in coefs),
        tiles_per_core=tiles_per_core,
        n_actual=n,
        mask_rows=(n_pad != n))

    # TODO(synk): on v7x the resident (C,P) blocks could be single-buffered
    # via pipeline_mode=pl.Buffered(1); left at the default here since they
    # are small relative to the 12 MiB tile budget.
    slabs = pl.pallas_call(
        kernel,
        out_shape=jax.ShapeDtypeStruct((ncores, _SUB, _LANE), jnp.float32),
        grid_spec=pltpu.PrefetchScalarGridSpec(
            num_scalar_prefetch=0,
            grid=grid,
            in_specs=[
                pl.BlockSpec((tb, c), row_map),           # logits (batch-tiled)
                pl.BlockSpec((tb, 1), row_map),           # target (narrow int32)
                pl.BlockSpec((tb, p), row_map),           # min_distances
                pl.BlockSpec((cw, pw), resident_map),     # prototype_class_identity
                pl.BlockSpec((cw, pw), resident_map),     # last-layer weight
                pl.BlockSpec((cw, pw), resident_map),     # l1 mask
            ],
            out_specs=pl.BlockSpec((1, _SUB, _LANE), lambda co, i: (co, 0, 0)),
            scratch_shapes=[pltpu.VMEM((tb, 1), jnp.float32) for _ in range(3)],
        ),
        compiler_params=pltpu.CompilerParams(
            # batch axis carries the accumulators -> sequential reduction axis;
            # leading core axis is parallel (megacore sharding on v7x).
            dimension_semantics=("parallel", "arbitrary")),
    )(logits_p, tgt_p, dist_p, proto_class_identity, last_layer_weight, l1_mask)

    # sum per-core partial slabs -> (128,) : lane 0 total, lanes 1..4 components
    return jnp.sum(slabs, axis=(0, 1))


# ------------------------------ module analog --------------------------------

class LossComponent:
    def __init__(self, name, required_forward_results, coefficient):
        self.name = name
        self.required_forward_results = tuple(required_forward_results)
        self.coefficient = float(coefficient)


class LinearBatchLoss:
    """JAX/Pallas analog of protopnet.model_losses.LinearBatchLoss.

    total = sum_i coef_i * loss_i ;  metrics[name_i] = coef_i * loss_i.
    The four canonical ProtoPNet components (cross_entropy, cluster,
    separation, l1) are fused into a single Pallas kernel.
    """
    # TODO(synk): arbitrary user-supplied loss callables cannot be fused into
    # the single kernel generically; only the canonical ProtoPNet set is fused.

    def __init__(self, batch_losses=(), num_cores=2,
                 vmem_budget_bytes=12 * 1024 * 1024, max_batch_tile=1024):
        self.batch_losses = list(batch_losses)
        self.num_cores = int(num_cores)
        self.vmem_budget_bytes = int(vmem_budget_bytes)
        self.max_batch_tile = int(max_batch_tile)

    def required_forward_results(self):
        return {req for lc in self.batch_losses
                for req in lc.required_forward_results}

    def __call__(self, **kwargs):
        metrics_dict = kwargs.get("metrics_dict", {})
        if not self.batch_losses:
            return jnp.float32(0.0), metrics_dict

        coef_by_name = {lc.name: lc.coefficient for lc in self.batch_losses}
        # absent components get coefficient 0.0 -> no effect on the total
        coefs = [coef_by_name.get(name, 0.0) for name in _CANONICAL]

        l1_mask = kwargs["l1_mask"]
        ident = kwargs.get("prototype_class_identity")
        if ident is None:
            ident = 1.0 - l1_mask   # ProtoPNet convention: l1_mask = 1 - identity

        slab = _fused_loss_call(
            kwargs["logits"], kwargs["target"], kwargs["min_distances"],
            ident, kwargs["last_layer_weight"], l1_mask, coefs,
            num_cores=self.num_cores,
            vmem_budget_bytes=self.vmem_budget_bytes,
            max_batch_tile=self.max_batch_tile)

        total = slab[0]
        for i, name in enumerate(_CANONICAL):
            if name in coef_by_name:
                metrics_dict[name] = slab[1 + i]    # coefficient * loss, as in torch
        return total, metrics_dict


# ---------------------------------- demo -------------------------------------

def _ref_total(logits, target, d, ident, w, l1m, coefs):
    logits = logits.astype(jnp.float32)
    d = d.astype(jnp.float32)
    logp = jax.nn.log_softmax(logits, axis=-1)
    ce = -jnp.mean(logp[jnp.arange(logits.shape[0]), target])
    mask = ident[target, :].astype(jnp.float32)     # reference-only gather
    big = jnp.float32(1e9)
    clst = jnp.mean(jnp.min(jnp.where(mask > 0.5, d, big), axis=-1))
    sep = jnp.mean(jnp.min(jnp.where(mask > 0.5, big, d), axis=-1))
    l1 = jnp.sum(jnp.abs(w.astype(jnp.float32) * l1m.astype(jnp.float32)))
    vals = (ce, clst, sep, l1)
    return sum(c * v for c, v in zip(coefs, vals))


if __name__ == "__main__":
    key = jax.random.PRNGKey(0)
    k1, k2, k3, k4 = jax.random.split(key, 4)

    N, C, P = 32, 8, 16          # batch, classes, prototypes (2 per class)

    logits = jax.random.normal(k1, (N, C), dtype=jnp.float32)
    target = jax.random.randint(k2, (N,), 0, C, dtype=jnp.int32)
    min_distances = jnp.abs(jax.random.normal(k3, (N, P), dtype=jnp.float32))
    last_layer_weight = jax.random.normal(k4, (C, P), dtype=jnp.float32) * 0.1

    proto_class = jnp.arange(P, dtype=jnp.int32) // (P // C)                 # (P,)
    prototype_class_identity = (proto_class[None, :] ==
                                jnp.arange(C, dtype=jnp.int32)[:, None]
                                ).astype(jnp.float32)                        # (C, P)
    l1_mask = 1.0 - prototype_class_identity                                 # (C, P)

    # memory-bound kernel: feed activations in bf16, accumulate in f32 in-kernel
    logits_bf = logits.astype(jnp.bfloat16)
    dist_bf = min_distances.astype(jnp.bfloat16)

    batch_losses = [
        LossComponent("cross_entropy", ("logits", "target"), 1.0),
        LossComponent("cluster", ("min_distances", "prototype_class_identity"), 0.8),
        LossComponent("separation", ("min_distances", "prototype_class_identity"), -0.08),
        LossComponent("l1", ("last_layer_weight", "l1_mask"), 1e-4),
    ]

    model = LinearBatchLoss(batch_losses)   # 2-way core split, VMEM-budgeted tile

    metrics = {}
    total, metrics = model(
        logits=logits_bf,
        target=target,
        min_distances=dist_bf,
        prototype_class_identity=prototype_class_identity,
        last_layer_weight=last_layer_weight,
        l1_mask=l1_mask,
        metrics_dict=metrics,
    )

    total = jax.block_until_ready(total)
    for v in metrics.values():
        jax.block_until_ready(v)

    # Pure-JAX reference cross-check on the same bf16-rounded inputs.
    coefs = [1.0, 0.8, -0.08, 1e-4]
    ref = _ref_total(logits_bf, target, dist_bf, prototype_class_identity,
                     last_layer_weight, l1_mask, coefs)
    if not bool(jnp.allclose(total, ref, rtol=1e-3, atol=1e-3)):
        raise RuntimeError(f"mismatch: kernel={float(total)} ref={float(ref)}")

    print("KERNEL_OK")
</pallas_src>

<mosaic_0001>
module attributes {stable_mosaic.version = 11 : i64} {
  func.func @_fused_loss_kernel(%arg0: i32, %arg1: i32, %arg2: memref<16x8xbf16, #tpu.memory_space<vmem>>, %arg3: memref<16x1xi32, #tpu.memory_space<vmem>>, %arg4: memref<16x16xbf16, #tpu.memory_space<vmem>>, %arg5: memref<8x16xf32, #tpu.memory_space<vmem>>, %arg6: memref<8x16xf32, #tpu.memory_space<vmem>>, %arg7: memref<8x16xf32, #tpu.memory_space<vmem>>, %arg8: memref<1x8x128xf32, #tpu.memory_space<vmem>>, %arg9: memref<16x1xf32, #tpu.memory_space<vmem>>, %arg10: memref<16x1xf32, #tpu.memory_space<vmem>>, %arg11: memref<16x1xf32, #tpu.memory_space<vmem>>) attributes {dimension_semantics = [#tpu.dimension_semantics<parallel>, #tpu.dimension_semantics<arbitrary>], iteration_bounds = array<i64: 2, 1>, scalar_prefetch = 0 : i64, scratch_operands = 3 : i64, tpu.core_type = #tpu.core_type<tc>, window_params = [{transform_indices = @transform_0, window_bounds = array<i64: 16, 8>}, {transform_indices = @transform_1, window_bounds = array<i64: 16, 1>}, {transform_indices = @transform_2, window_bounds = array<i64: 16, 16>}, {pipeline_mode = #tpu.pipeline_mode<synchronous>, transform_indices = @transform_3, window_bounds = array<i64: 8, 16>}, {pipeline_mode = #tpu.pipeline_mode<synchronous>, transform_indices = @transform_4, window_bounds = array<i64: 8, 16>}, {pipeline_mode = #tpu.pipeline_mode<synchronous>, transform_indices = @transform_5, window_bounds = array<i64: 8, 16>}, {transform_indices = @transform_6, window_bounds = array<i64: 1, 8, 128>}]} {
    %c0_i32 = arith.constant 0 : i32
    %0 = arith.cmpi eq, %arg1, %c0_i32 : i32
    %1 = arith.extui %0 : i1 to i32
    %c0_i32_0 = arith.constant 0 : i32
    %2 = arith.cmpi ne, %1, %c0_i32_0 : i32
    scf.if %2 {
      %cst_30 = arith.constant 0.000000e+00 : f32
      %50 = vector.broadcast %cst_30 : f32 to vector<16x1xf32>
      %c0_31 = arith.constant 0 : index
      %c0_32 = arith.constant 0 : index
      %51 = vector.load %arg9[%c0_31, %c0_32] : memref<16x1xf32, #tpu.memory_space<vmem>>, vector<16x1xf32>
      tpu.vector_store %arg9[%c0_31, %c0_32], %50 {strides = array<i32>} : memref<16x1xf32, #tpu.memory_space<vmem>>, vector<16x1xf32>,
      %cst_33 = arith.constant 0.000000e+00 : f32
      %52 = vector.broadcast %cst_33 : f32 to vector<16x1xf32>
      %c0_34 = arith.constant 0 : index
      %c0_35 = arith.constant 0 : index
      %53 = vector.load %arg10[%c0_34, %c0_35] : memref<16x1xf32, #tpu.memory_space<vmem>>, vector<16x1xf32>
      tpu.vector_store %arg10[%c0_34, %c0_35], %52 {strides = array<i32>} : memref<16x1xf32, #tpu.memory_space<vmem>>, vector<16x1xf32>,
      %cst_36 = arith.constant 0.000000e+00 : f32
      %54 = vector.broadcast %cst_36 : f32 to vector<16x1xf32>
      %c0_37 = arith.constant 0 : index
      %c0_38 = arith.constant 0 : index
      %55 = vector.load %arg11[%c0_37, %c0_38] : memref<16x1xf32, #tpu.memory_space<vmem>>, vector<16x1xf32>
      tpu.vector_store %arg11[%c0_37, %c0_38], %54 {strides = array<i32>} : memref<16x1xf32, #tpu.memory_space<vmem>>, vector<16x1xf32>,
    } else {
    }
    %c0 = arith.constant 0 : index
    %c0_1 = arith.constant 0 : index
    %3 = vector.load %arg2[%c0, %c0_1] : memref<16x8xbf16, #tpu.memory_space<vmem>>, vector<16x8xbf16>
    %4 = arith.extf %3 : vector<16x8xbf16> to vector<16x8xf32>
    %c0_2 = arith.constant 0 : index
    %c0_3 = arith.constant 0 : index
    %5 = vector.load %arg3[%c0_2, %c0_3] : memref<16x1xi32, #tpu.memory_space<vmem>>, vector<16x1xi32>
    %6 = tpu.iota {dimensions = array<i32: 1>} : vector<16x8xi32>
    %7 = vector.broadcast %5 : vector<16x1xi32> to vector<16x8xi32>
    %8 = arith.cmpi eq, %6, %7 : vector<16x8xi32>
    %9 = arith.extui %8 : vector<16x8xi1> to vector<16x8xi32>
    %10 = arith.sitofp %9 : vector<16x8xi32> to vector<16x8xf32>
    %cst = arith.constant dense<0xFF800000> : vector<16xf32>
    %11 = vector.multi_reduction <maximumf>, %4, %cst [1] : vector<16x8xf32> to vector<16xf32>
    %12 = vector.shape_cast %11 : vector<16xf32> to vector<16x1xf32>
    %13 = vector.broadcast %12 : vector<16x1xf32> to vector<16x8xf32>
    %14 = arith.subf %4, %13 : vector<16x8xf32>
    %15 = math.exp %14 : vector<16x8xf32>
    %cst_4 = arith.constant dense<0.000000e+00> : vector<16xf32>
    %16 = vector.multi_reduction <add>, %15, %cst_4 [1] : vector<16x8xf32> to vector<16xf32>
    %17 = vector.shape_cast %16 : vector<16xf32> to vector<16x1xf32>
    %18 = math.log %17 : vector<16x1xf32>
    %19 = arith.addf %12, %18 : vector<16x1xf32>
    %20 = arith.mulf %4, %10 : vector<16x8xf32>
    %cst_5 = arith.constant dense<0.000000e+00> : vector<16xf32>
    %21 = vector.multi_reduction <add>, %20, %cst_5 [1] : vector<16x8xf32> to vector<16xf32>
    %22 = vector.shape_cast %21 : vector<16xf32> to vector<16x1xf32>
    %23 = arith.subf %19, %22 : vector<16x1xf32>
    %c0_6 = arith.constant 0 : index
    %c0_7 = arith.constant 0 : index
    %24 = vector.load %arg5[%c0_6, %c0_7] : memref<8x16xf32, #tpu.memory_space<vmem>>, vector<8x16xf32>
    %cst_8 = arith.constant dense<0.000000e+00> : vector<16x16xf32>
    %25 = tpu.matmul %10, %24, %cst_8 {dimension_numbers = #tpu.dot_dimension_numbers<[1], [0], [0], [1], [0, 0, 1, 1], [], []>} : vector<16x8xf32>, vector<8x16xf32>, vector<16x16xf32> -> vector<16x16xf32>
    %cst_9 = arith.constant 5.000000e-01 : f32
    %26 = vector.broadcast %cst_9 : f32 to vector<16x16xf32>
    %27 = arith.cmpf ogt, %25, %26 : vector<16x16xf32>
    %c0_10 = arith.constant 0 : index
    %c0_11 = arith.constant 0 : index
    %28 = vector.load %arg4[%c0_10, %c0_11] : memref<16x16xbf16, #tpu.memory_space<vmem>>, vector<16x16xbf16>
    %29 = arith.extf %28 : vector<16x16xbf16> to vector<16x16xf32>
    %cst_12 = arith.constant 1.000000e+09 : f32
    %30 = vector.broadcast %cst_12 : f32 to vector<16x16xf32>
    %31 = arith.select %27, %29, %30 : vector<16x16xi1>, vector<16x16xf32>
    %cst_13 = arith.constant dense<0x7F800000> : vector<16xf32>
    %32 = vector.multi_reduction <minimumf>, %31, %cst_13 [1] : vector<16x16xf32> to vector<16xf32>
    %33 = vector.shape_cast %32 : vector<16xf32> to vector<16x1xf32>
    %cst_14 = arith.constant 1.000000e+09 : f32
    %34 = vector.broadcast %cst_14 : f32 to vector<16x16xf32>
    %35 = arith.select %27, %34, %29 : vector<16x16xi1>, vector<16x16xf32>
    %cst_15 = arith.constant dense<0x7F800000> : vector<16xf32>
    %36 = vector.multi_reduction <minimumf>, %35, %cst_15 [1] : vector<16x16xf32> to vector<16xf32>
    %37 = vector.shape_cast %36 : vector<16xf32> to vector<16x1xf32>
    %c0_16 = arith.constant 0 : index
    %c0_17 = arith.constant 0 : index
    %38 = vector.load %arg9[%c0_16, %c0_17] : memref<16x1xf32, #tpu.memory_space<vmem>>, vector<16x1xf32>
    %39 = arith.addf %38, %23 : vector<16x1xf32>
    %c0_18 = arith.constant 0 : index
    %c0_19 = arith.constant 0 : index
    %40 = vector.load %arg9[%c0_18, %c0_19] : memref<16x1xf32, #tpu.memory_space<vmem>>, vector<16x1xf32>
    tpu.vector_store %arg9[%c0_18, %c0_19], %39 {strides = array<i32>} : memref<16x1xf32, #tpu.memory_space<vmem>>, vector<16x1xf32>,
    %c0_20 = arith.constant 0 : index
    %c0_21 = arith.constant 0 : index
    %41 = vector.load %arg10[%c0_20, %c0_21] : memref<16x1xf32, #tpu.memory_space<vmem>>, vector<16x1xf32>
    %42 = arith.addf %41, %33 : vector<16x1xf32>
    %c0_22 = arith.constant 0 : index
    %c0_23 = arith.constant 0 : index
    %43 = vector.load %arg10[%c0_22, %c0_23] : memref<16x1xf32, #tpu.memory_space<vmem>>, vector<16x1xf32>
    tpu.vector_store %arg10[%c0_22, %c0_23], %42 {strides = array<i32>} : memref<16x1xf32, #tpu.memory_space<vmem>>, vector<16x1xf32>,
    %c0_24 = arith.constant 0 : index
    %c0_25 = arith.constant 0 : index
    %44 = vector.load %arg11[%c0_24, %c0_25] : memref<16x1xf32, #tpu.memory_space<vmem>>, vector<16x1xf32>
    %45 = arith.addf %44, %37 : vector<16x1xf32>
    %c0_26 = arith.constant 0 : index
    %c0_27 = arith.constant 0 : index
    %46 = vector.load %arg11[%c0_26, %c0_27] : memref<16x1xf32, #tpu.memory_space<vmem>>, vector<16x1xf32>
    tpu.vector_store %arg11[%c0_26, %c0_27], %45 {strides = array<i32>} : memref<16x1xf32, #tpu.memory_space<vmem>>, vector<16x1xf32>,
    %c0_i32_28 = arith.constant 0 : i32
    %47 = arith.cmpi eq, %arg1, %c0_i32_28 : i32
    %48 = arith.extui %47 : i1 to i32
    %c0_i32_29 = arith.constant 0 : i32
    %49 = arith.cmpi ne, %48, %c0_i32_29 : i32
    scf.if %49 {
      %c0_30 = arith.constant 0 : index
      %c0_31 = arith.constant 0 : index
      %50 = vector.load %arg9[%c0_30, %c0_31] : memref<16x1xf32, #tpu.memory_space<vmem>>, vector<16x1xf32>
      %cst_32 = arith.constant dense<0.000000e+00> : vector<1xf32>
      %51 = vector.multi_reduction <add>, %50, %cst_32 [0] : vector<16x1xf32> to vector<1xf32>
      %52 = vector.shape_cast %51 : vector<1xf32> to vector<1x1xf32>
      %cst_33 = arith.constant 3.125000e-02 : f32
      %53 = vector.broadcast %cst_33 : f32 to vector<1x1xf32>
      %54 = arith.mulf %52, %53 : vector<1x1xf32>
      %c0_34 = arith.constant 0 : index
      %c0_35 = arith.constant 0 : index
      %55 = vector.load %arg10[%c0_34, %c0_35] : memref<16x1xf32, #tpu.memory_space<vmem>>, vector<16x1xf32>
      %cst_36 = arith.constant dense<0.000000e+00> : vector<1xf32>
      %56 = vector.multi_reduction <add>, %55, %cst_36 [0] : vector<16x1xf32> to vector<1xf32>
      %57 = vector.shape_cast %56 : vector<1xf32> to vector<1x1xf32>
      %cst_37 = arith.constant 3.125000e-02 : f32
      %58 = vector.broadcast %cst_37 : f32 to vector<1x1xf32>
      %59 = arith.mulf %57, %58 : vector<1x1xf32>
      %c0_38 = arith.constant 0 : index
      %c0_39 = arith.constant 0 : index
      %60 = vector.load %arg11[%c0_38, %c0_39] : memref<16x1xf32, #tpu.memory_space<vmem>>, vector<16x1xf32>
      %cst_40 = arith.constant dense<0.000000e+00> : vector<1xf32>
      %61 = vector.multi_reduction <add>, %60, %cst_40 [0] : vector<16x1xf32> to vector<1xf32>
      %62 = vector.shape_cast %61 : vector<1xf32> to vector<1x1xf32>
      %cst_41 = arith.constant 3.125000e-02 : f32
      %63 = vector.broadcast %cst_41 : f32 to vector<1x1xf32>
      %64 = arith.mulf %62, %63 : vector<1x1xf32>
      %c0_42 = arith.constant 0 : index
      %c0_43 = arith.constant 0 : index
      %65 = vector.load %arg6[%c0_42, %c0_43] : memref<8x16xf32, #tpu.memory_space<vmem>>, vector<8x16xf32>
      %c0_44 = arith.constant 0 : index
      %c0_45 = arith.constant 0 : index
      %66 = vector.load %arg7[%c0_44, %c0_45] : memref<8x16xf32, #tpu.memory_space<vmem>>, vector<8x16xf32>
      %67 = arith.mulf %65, %66 : vector<8x16xf32>
      %68 = math.absf %67 : vector<8x16xf32>
      %cst_46 = arith.constant dense<0.000000e+00> : vector<8xf32>
      %69 = vector.multi_reduction <add>, %68, %cst_46 [1] : vector<8x16xf32> to vector<8xf32>
      %70 = vector.shape_cast %69 : vector<8xf32> to vector<8x1xf32>
      %cst_47 = arith.constant dense<0.000000e+00> : vector<1xf32>
      %71 = vector.multi_reduction <add>, %70, %cst_47 [0] : vector<8x1xf32> to vector<1xf32>
      %72 = vector.shape_cast %71 : vector<1xf32> to vector<1x1xf32>
      %c0_i32_48 = arith.constant 0 : i32
      %73 = arith.cmpi eq, %arg0, %c0_i32_48 : i32
      %74 = arith.extui %73 : i1 to i32
      %75 = arith.sitofp %74 : i32 to f32
      %76 = vector.broadcast %75 : f32 to vector<1x1xf32>
      %77 = arith.mulf %72, %76 : vector<1x1xf32>
      %cst_49 = arith.constant 1.000000e+00 : f32
      %78 = vector.broadcast %cst_49 : f32 to vector<1x1xf32>
      %79 = arith.mulf %54, %78 : vector<1x1xf32>
      %cst_50 = arith.constant 8.000000e-01 : f32
      %80 = vector.broadcast %cst_50 : f32 to vector<1x1xf32>
      %81 = arith.mulf %59, %80 : vector<1x1xf32>
      %cst_51 = arith.constant -8.000000e-02 : f32
      %82 = vector.broadcast %cst_51 : f32 to vector<1x1xf32>
      %83 = arith.mulf %64, %82 : vector<1x1xf32>
      %cst_52 = arith.constant 9.99999974E-5 : f32
      %84 = vector.broadcast %cst_52 : f32 to vector<1x1xf32>
      %85 = arith.mulf %77, %84 : vector<1x1xf32>
      %86 = arith.addf %79, %81 : vector<1x1xf32>
      %87 = arith.addf %86, %83 : vector<1x1xf32>
      %88 = arith.addf %87, %85 : vector<1x1xf32>
      %89 = tpu.iota {dimensions = array<i32: 0>} : vector<8x128xi32>
      %90 = tpu.iota {dimensions = array<i32: 1>} : vector<8x128xi32>
      %c0_i32_53 = arith.constant 0 : i32
      %91 = vector.broadcast %c0_i32_53 : i32 to vector<8x128xi32>
      %92 = arith.cmpi eq, %89, %91 : vector<8x128xi32>
      %c0_i32_54 = arith.constant 0 : i32
      %93 = vector.broadcast %c0_i32_54 : i32 to vector<8x128xi32>
      %94 = arith.cmpi eq, %90, %93 : vector<8x128xi32>
      %95 = arith.andi %92, %94 : vector<8x128xi1>
      %cst_55 = arith.constant 0.000000e+00 : f32
      %96 = vector.shape_cast %88 : vector<1x1xf32> to vector<1x1xf32>
      %97 = vector.broadcast %96 : vector<1x1xf32> to vector<8x128xf32>
      %98 = vector.broadcast %cst_55 : f32 to vector<8x128xf32>
      %99 = arith.select %95, %97, %98 : vector<8x128xi1>, vector<8x128xf32>
      %c1_i32 = arith.constant 1 : i32
      %100 = vector.broadcast %c1_i32 : i32 to vector<8x128xi32>
      %101 = arith.cmpi eq, %90, %100 : vector<8x128xi32>
      %102 = arith.andi %92, %101 : vector<8x128xi1>
      %103 = vector.shape_cast %79 : vector<1x1xf32> to vector<1x1xf32>
      %104 = vector.broadcast %103 : vector<1x1xf32> to vector<8x128xf32>
      %105 = arith.select %102, %104, %99 : vector<8x128xi1>, vector<8x128xf32>
      %c2_i32 = arith.constant 2 : i32
      %106 = vector.broadcast %c2_i32 : i32 to vector<8x128xi32>
      %107 = arith.cmpi eq, %90, %106 : vector<8x128xi32>
      %108 = arith.andi %92, %107 : vector<8x128xi1>
      %109 = vector.shape_cast %81 : vector<1x1xf32> to vector<1x1xf32>
      %110 = vector.broadcast %109 : vector<1x1xf32> to vector<8x128xf32>
      %111 = arith.select %108, %110, %105 : vector<8x128xi1>, vector<8x128xf32>
      %c3_i32 = arith.constant 3 : i32
      %112 = vector.broadcast %c3_i32 : i32 to vector<8x128xi32>
      %113 = arith.cmpi eq, %90, %112 : vector<8x128xi32>
      %114 = arith.andi %92, %113 : vector<8x128xi1>
      %115 = vector.shape_cast %83 : vector<1x1xf32> to vector<1x1xf32>
      %116 = vector.broadcast %115 : vector<1x1xf32> to vector<8x128xf32>
      %117 = arith.select %114, %116, %111 : vector<8x128xi1>, vector<8x128xf32>
      %c4_i32 = arith.constant 4 : i32
      %118 = vector.broadcast %c4_i32 : i32 to vector<8x128xi32>
      %119 = arith.cmpi eq, %90, %118 : vector<8x128xi32>
      %120 = arith.andi %92, %119 : vector<8x128xi1>
      %121 = vector.shape_cast %85 : vector<1x1xf32> to vector<1x1xf32>
      %122 = vector.broadcast %121 : vector<1x1xf32> to vector<8x128xf32>
      %123 = arith.select %120, %122, %117 : vector<8x128xi1>, vector<8x128xf32>
      %124 = vector.shape_cast %123 : vector<8x128xf32> to vector<1x8x128xf32>
      %c0_56 = arith.constant 0 : index
      %c0_57 = arith.constant 0 : index
      %c0_58 = arith.constant 0 : index
      %125 = vector.load %arg8[%c0_56, %c0_57, %c0_58] : memref<1x8x128xf32, #tpu.memory_space<vmem>>, vector<1x8x128xf32>
      tpu.vector_store %arg8[%c0_56, %c0_57, %c0_58], %124 {strides = array<i32>} : memref<1x8x128xf32, #tpu.memory_space<vmem>>, vector<1x8x128xf32>,
    } else {
    }
    return
  }
  func.func @transform_0(%arg0: i32, %arg1: i32) -> (i32, i32) {
    %c1_i32 = arith.constant 1 : i32
    %0 = arith.muli %arg0, %c1_i32 : i32
    %1 = arith.addi %0, %arg1 : i32
    %c0_i32 = arith.constant 0 : i32
    %c0_i32_0 = arith.constant 0 : i32
    return %1, %c0_i32 : i32, i32
  }
  func.func @transform_1(%arg0: i32, %arg1: i32) -> (i32, i32) {
    %c1_i32 = arith.constant 1 : i32
    %0 = arith.muli %arg0, %c1_i32 : i32
    %1 = arith.addi %0, %arg1 : i32
    %c0_i32 = arith.constant 0 : i32
    %c0_i32_0 = arith.constant 0 : i32
    return %1, %c0_i32 : i32, i32
  }
  func.func @transform_2(%arg0: i32, %arg1: i32) -> (i32, i32) {
    %c1_i32 = arith.constant 1 : i32
    %0 = arith.muli %arg0, %c1_i32 : i32
    %1 = arith.addi %0, %arg1 : i32
    %c0_i32 = arith.constant 0 : i32
    %c0_i32_0 = arith.constant 0 : i32
    return %1, %c0_i32 : i32, i32
  }
  func.func @transform_3(%arg0: i32, %arg1: i32) -> (i32, i32) {
    %c0_i32 = arith.constant 0 : i32
    %c0_i32_0 = arith.constant 0 : i32
    %c0_i32_1 = arith.constant 0 : i32
    return %c0_i32, %c0_i32_0 : i32, i32
  }
  func.func @transform_4(%arg0: i32, %arg1: i32) -> (i32, i32) {
    %c0_i32 = arith.constant 0 : i32
    %c0_i32_0 = arith.constant 0 : i32
    %c0_i32_1 = arith.constant 0 : i32
    return %c0_i32, %c0_i32_0 : i32, i32
  }
  func.func @transform_5(%arg0: i32, %arg1: i32) -> (i32, i32) {
    %c0_i32 = arith.constant 0 : i32
    %c0_i32_0 = arith.constant 0 : i32
    %c0_i32_1 = arith.constant 0 : i32
    return %c0_i32, %c0_i32_0 : i32, i32
  }
  func.func @transform_6(%arg0: i32, %arg1: i32) -> (i32, i32, i32) {
    %c0_i32 = arith.constant 0 : i32
    %c0_i32_0 = arith.constant 0 : i32
    %c0_i32_1 = arith.constant 0 : i32
    return %arg0, %c0_i32, %c0_i32_0 : i32, i32, i32
  }
}

</mosaic_0001>

<bundles_post_ra>
// kernel: tpu_custom_call.1
= control target key start
LH: loop header
LB: loop body
LE: loop exit
PB: predicated region body
PF: predicated region fallthrough
CT: control target
= control target key end

     0   :  { %11 = vsyncpa [#allocation6], 0  ;;  %s1131_s0 = inlined_call_operand.vmem [shape: bf16[32,8], index: 0, kind: input, shape index: {}]   ;;  %s1132_s1 = inlined_call_operand.vmem [shape: s32[32,1], index: 1, kind: input, shape index: {}]   ;;  %s1133_s2 = inlined_call_operand.vmem [shape: bf16[32,16], index: 2, kind: input, shape index: {}]   ;;  %s1134_s3 = inlined_call_operand.vmem [shape: f32[8,16], index: 3, kind: input, shape index: {}]   ;;  %s1135_s4 = inlined_call_operand.vmem [shape: f32[8,16], index: 4, kind: input, shape index: {}]   ;;  %s1136_s5 = inlined_call_operand.vmem [shape: f32[8,16], index: 5, kind: input, shape index: {}]   ;;  %s1137_s6 = inlined_call_operand.hbm [shape: f32[2,8,128], index: 6, kind: output, shape index: {}]  }
   0x1   :  { %13 = vsyncpa [#allocation6 + $0x1], 0  ;;  %s947_s21 = smov 0   ;;  %s949_s22 = smov 0  }
   0x2   :  { %s951_s23 = smov 0   ;;  %s953_s24 = smov 0  }
   0x3   :  { %s955_s25 = smov 0   ;;  %s957_s26 = smov 0  }
   0x4 LB: > { %s726_s27 = sadd.s32 4294967295, %s907_s26   ;;  %s727_s28 = sadd.s32 4294967294, %s907_s26   ;;  %s907_s26 = sphi %s957_s26, %s19_s26   ;;  %s903_s25 = sphi %s955_s25, %s1144_s25   ;;  %s899_s24 = sphi %s953_s24, %s1143_s24   ;;  %s895_s23 = sphi %s951_s23, %s1142_s23   ;;  %s891_s22 = sphi %s949_s22, %s1141_s22   ;;  %s887_s21 = sphi %s947_s21, %s1140_s21  }
   0x5   : > { %s31_s29 = sadd.s32 1, %s903_s25  ;;  %s185_s30 = sadd.s32 1, %s895_s23 }
   0x6   : > { %p33_p0 = scmp.ge.s32.totalorder %s31_s29, 2  ;;  %p195_p1 = scmp.ne.s32.totalorder %s895_s23, %s891_s22 }
   0x7   : > { %p196_p2 = scmp.eq.s32.totalorder %s726_s27, 1  ;;  %p201_p3 = scmp.ne.s32.totalorder %s891_s22, %s887_s21 }
   0x8   : > { %s1146_s29 = smov (%p33_p0, %s31_s29), 0  ;;  %p202_p5 = scmp.eq.s32.totalorder %s727_s28, 1 }
   0x9   : > { %p987_p4 = por %p196_p2, %p195_p1  ;;  %s182_s8 = ssub.s32 %s903_s25, %s1146_s29 }
   0xa   : > { %p730_p6 = scmp.ge.s32.totalorder %s907_s26, 1  ;;  %p183_p7 = scmp.eq.s32.totalorder %s182_s8, 0 }
   0xb   : > { %p994_p8 = por %p202_p5, %p201_p3  ;;  %p262_p9 = scmp.lt.s32.totalorder %s907_s26, 3 }
   0xc   : > { %s1000_s10 = scalar_select %p183_p7, %s895_s23, %s185_s30  }
   0xd   : > { %p263_p10 = pnand %p730_p6, %p262_p9 }
   0xe   : > { %s732_s11 = sshll.u32 (!%p263_p10), %s899_s24, 1  ;;  %v909_v0 = vmov (!%p263_p10), 0   ;;  %vm360_vm0 = vcmask (!%p263_p10), 64512   ;;  %v395_v7 = vld [vmem:[%s1134_s3] sm:$0xff] (!%p263_p10)  ;;  %v346_v9 = vlaneseq (!%p263_p10)  ;;  %v910_v12 = vmov (!%p263_p10), 0.0   ;;  %p571_p12 = scmp.eq.s32.totalorder (!%p263_p10), %s899_s24, 0 }
   0xf   : > { %266 = sbr.rel (%p263_p10) target bundleno = 710 (0x2c6), region = 44  ;;  %819 = vset.pattern.permute.xlu0 (!%p263_p10), %v909_v0  ;;  %p307_p11 = scmp.lt.s32.totalorder (!%p263_p10), %s732_s11, 3  ;;  %820 = vset.pattern.permute.xlu1 (!%p263_p10), %v909_v0  ;;  %vm333_vm3 = vcmask (!%p263_p10), 7168   ;;  %vm485_vm4 = vcmask (!%p263_p10), 130048   ;;  %v558_v57 = vld [vmem:[%s1135_s4] sm:$0xff] (!%p263_p10) }
  0x10   : > { %757 = vmatprep.subr.mxu0 (!%p263_p10), %v395_v7  ;;  %v1021_v10 = vand.u32 (!%p263_p10), 127, %v346_v9  ;;  %334 = vst.msk [vmem:[#allocation2] sm:$0xff] (!%p263_p10), %vm333_vm3, %v910_v12  ;;  %335 = vst.msk [vmem:[#allocation2 + $0x8] sm:$0xff] (!%p263_p10), %vm333_vm3, %v910_v12  ;;  %v559_v58 = vld [vmem:[%s1136_s5] sm:$0xff] (!%p263_p10)  ;;  %s302_s17 = sand.u32 (!%p263_p10), 1, %s891_s22  }
  0x11   : > { %758 = vmatpush3.msra.mxu0 (!%p263_p10), %v395_v7  ;;  %336 = vst.msk [vmem:[#allocation3] sm:$0xff] (!%p263_p10), %vm333_vm3, %v910_v12  ;;  %337 = vst.msk [vmem:[#allocation3 + $0x8] sm:$0xff] (!%p263_p10), %vm333_vm3, %v910_v12  ;;  %v560_v63 = vmul.f32 (!%p263_p10), %v559_v58, %v558_v57  ;;  %s731_s18 = sshll.u32 (!%p263_p10), %s302_s17, 3 }
  0x12   : > { %338 = vst.msk [vmem:[#allocation4] sm:$0xff] (!%p263_p10), %vm333_vm3, %v910_v12  ;;  %339 = vst.msk [vmem:[#allocation4 + $0x8] sm:$0xff] (!%p263_p10), %vm333_vm3, %v910_v12  ;;  %vm585_vm8 = vcmp.eq.s32.totalorder (!%p263_p10), %v1021_v10, 0  ;;  %vm593_vm9 = vcmp.eq.s32.totalorder (!%p263_p10), %v1021_v10, 1  ;;  %vm601_vm10 = vcmp.eq.s32.totalorder (!%p263_p10), %v1021_v10, 2  ;;  %vm609_vm13 = vcmp.eq.s32.totalorder (!%p263_p10), %v1021_v10, 3 }
  0x13   : > { %vm617_vm15 = vcmp.eq.s32.totalorder (!%p263_p10), %v1021_v10, 4  ;;  %s304_s20 = scalar_lea.vmem (!%p263_p10), [#allocation5], %s731_s18 }
  0x14   : > { %s635_s27 = sshll.u32 (!%p263_p10), %s304_s20, 4  ;;  %s1086_s27 = int_to_ptr.vmem [resolvable:$true] %s635_s27 }
  0x16   : > { %s1148_s11 = smov (!%p307_p11, %s732_s11), 3 }
  0x17   : > { %s735_s12 = sshll.u32 %s1148_s11, 3  ;;  %s733_s13 = sshll.u32 %s1148_s11, 2  ;;  %v500_v37 = vld [vmem:[#allocation2] sm:$0xff]  ;;  %v501_v42 = vld [vmem:[#allocation2 + $0x8] sm:$0xff] }
  0x18   : > { %s318_s16 = scalar_lea.vmem %s1132_s1, %s735_s12  ;;  %s310_s19 = scalar_lea.vmem %s1131_s0, %s733_s13 }
  0x19   : > { %v344_v1 = vld [vmem:[%s318_s16] sm:$0xff]  ;;  %v345_v5 = vld [vmem:[%s318_s16 + $0x8] sm:$0xff]  ;;  %s326_s8 = scalar_lea.vmem %s1133_s2, %s733_s13  ;;  %s829_s11 = scalar_lea.vmem %s1086_s27, 128 }
  0x1a   : > { %v747_v2 = vld [vmem:[%s310_s19] sm:$0xff]   ;;  %349 = vperm.xlu0 %819, %v344_v1   ;;  %s572_s15 = scalar_select %p571_p12, 1, 0 }
  0x1b   : > { %v748_v3 = vunpack.c.l.bf16 %v747_v2  ;;  %v749_v4 = vunpack.c.h.bf16 %v747_v2  ;;  %v751_v46 = vld [vmem:[%s326_s8] sm:$0xff]   ;;  %s743_s19 = sshll.u32 %s899_s24, 7  ;;  %s622_s24 = scalar_lea.sflag [#allocation6], %s302_s17 }
  0x1c   : > { %v753_v47 = vunpack.c.h.bf16 %v751_v46  ;;  %v752_v49 = vunpack.c.l.bf16 %v751_v46  ;;  %s573_s16 = scvt.s32.f32 %s572_s15  ;;  %s1084_s8 = scalar_lea.hbm %s1137_s6, %s743_s19 }
  0x1d   : > { %v361_v6 = vsel %vm360_vm0, %v748_v3, -inf  ;;  %v364_v8 = vsel %vm360_vm0, %v749_v4, -inf  ;;  %p830_p13 = scmp.ne.s32.totalorder %s1086_s27, %s829_s11  ;;  %s911_s12 = smov [#allocation5]  }
  0x1e   : > { %362 = vmax.xlane.f32.xlu1 %v361_v6  ;;  %352 = vperm.xlu0 %819, %v345_v5   ;;  %s833_s13 = sshll.u32 %s911_s12, 4  ;;  %s834_s13 = int_to_ptr.vmem [resolvable:$false] %s833_s13 }
  0x1f   : > { %p831_p0 = pnand %p830_p13, %p987_p4  ;;  %s835_s14 = scalar_lea.vmem %s834_s13, 256 }
  0x20   : > { %p836_p2 = scmp.lt.s32.totalorder %s1086_s27, %s834_s13  ;;  %p837_p3 = scmp.lt.s32.totalorder %s835_s14, %s829_s11 }
  0x21   : > { %p832_p1 = pneg %p831_p0 }
  0x22   : > { %365 = vmax.xlane.f32.xlu1 %v364_v8  ;;  %p838_p5 = por %p837_p3, %p836_p2 }
  0x24   : > { %p839_p6 = pnand %p838_p5, %p832_p1 }
  0x99   : > { %v350_v11 = vpop.permute.xlu0 %349 }
  0x9a   : > { %vm354_vm1 = vcmp.eq.s32.totalorder %v1021_v10, %v350_v11 }
  0x9b   : > { %v738_v13 = vsel %vm354_vm1, 1.0, %v910_v12 }
  0x9c   : > { %v385_v14 = vmul.f32 %v748_v3, %v738_v13  ;;  %759 = vmatprep.mubr.msk.f32.mxu0 %vm360_vm0, %v738_v13 }
  0x9d   : > { %v353_v15 = vpop.permute.xlu0 %352 }
  0x9e   : > { %vm355_vm2 = vcmp.eq.s32.totalorder %v1021_v10, %v353_v15  ;;  %v387_v16 = vsel %vm360_vm0, %v385_v14, 0.0  ;;  %v508_v14 = vld [vmem:[#allocation3 + $0x8] sm:$0xff] }
  0x9f   : > { %v739_v17 = vsel %vm355_vm2, 1.0, %v910_v12  ;;  %388 = vadd.xlane.f32.xlu1 %v387_v16 }
  0xa0   : > { %760 = vmatmul.mubr.msk.f32.vlgmr.msra.gmra.mrb[0].mxu0 %vm360_vm0, %v739_v17  ;;  %v386_v28 = vmul.f32 %v749_v4, %v739_v17  ;;  %v507_v17 = vld [vmem:[#allocation3] sm:$0xff] }
  0xa2   : > { %v390_v29 = vsel %vm360_vm0, %v386_v28, 0.0 }
  0xab   : > { %v363_v18 = vpop.xlane.xlu1 %362 }
  0xac   : > { %v367_v19 = vsub.f32 %v748_v3, %v363_v18  ;;  %v561_v3 = vand.u32 2147483647, %v560_v63 }
  0xae   : > { %v369_v20 = vmul.f32 1.442695, %v367_v19  ;;  %v562_v6 = vsel %vm485_vm4, %v561_v3, 0.0 }
  0xaf   : > { %v366_v21 = vpop.xlane.xlu1 %365 }
  0xb0   : > { %821 = vpow2.f32 %v369_v20  ;;  %v368_v22 = vsub.f32 %v749_v4, %v366_v21  ;;  %v513_v20 = vld [vmem:[#allocation4] sm:$0xff] }
  0xb2   : > { %v371_v23 = vmul.f32 1.442695, %v368_v22 }
  0xb4   : > { %823 = vpow2.f32 %v371_v23  ;;  %v514_v23 = vld [vmem:[#allocation4 + $0x8] sm:$0xff] }
  0xba   : > { %v822_v24 = vpop.eup %821 }
  0xbb   : > { %v373_v25 = vsel %vm360_vm0, %v822_v24, 0.0 }
  0xbc   : > { %374 = vadd.xlane.f32.xlu0 %v373_v25 }
  0xbe   : > { %v824_v26 = vpop.eup %823 }
  0xbf   : > { %v376_v27 = vsel %vm360_vm0, %v824_v26, 0.0 }
  0xc0   : > { %377 = vadd.xlane.f32.xlu1 %v376_v27 }
  0xc4   : > { %391 = vadd.xlane.f32.xlu1 %v390_v29 }
 0x12c   : > { %v389_v30 = vpop.xlane.xlu1 %388 }
 0x149   : > { %v375_v31 = vpop.xlane.xlu0 %374 }
 0x14a   : > { %825 = vlog2.f32 %v375_v31 }
 0x14d   : > { %v378_v32 = vpop.xlane.xlu1 %377 }
 0x14e   : > { %827 = vlog2.f32 %v378_v32 }
 0x151   : > { %v392_v43 = vpop.xlane.xlu1 %391 }
 0x154   : > { %v826_v33 = vpop.eup %825 }
 0x155   : > { %v380_v34 = vmul.f32 0.6931472, %v826_v33 }
 0x157   : > { %v383_v35 = vadd.f32 %v380_v34, %v363_v18 }
 0x158   : > { %v828_v36 = vpop.eup %827 }
 0x159   : > { %v393_v38 = vsub.f32 %v383_v35, %v389_v30  ;;  %v382_v39 = vmul.f32 0.6931472, %v828_v36 }
 0x15b   : > { %v502_v40 = vadd.f32 %v500_v37, %v393_v38  ;;  %v384_v41 = vadd.f32 %v382_v39, %v366_v21 }
 0x15d   : > { %505 = vst.msk [vmem:[#allocation2] sm:$0xff] %vm333_vm3, %v502_v40  ;;  %v394_v44 = vsub.f32 %v384_v41, %v392_v43 }
 0x15f   : > { %v503_v45 = vadd.f32 %v501_v42, %v394_v44 }
 0x161   : > { %506 = vst.msk [vmem:[#allocation2 + $0x8] sm:$0xff] %vm333_vm3, %v503_v45 }
 0x164   : > { %v522_v54 = vld [vmem:[#allocation2] sm:$0xff] }
 0x165   : > { %v524_v59 = vsel %vm333_vm3, %v522_v54, 0.0 }
 0x168   : > { %v523_v51 = vld [vmem:[#allocation2 + $0x8] sm:$0xff] }
 0x169   : > { %v525_v56 = vsel %vm333_vm3, %v523_v51, 0.0 }
 0x16a   : > { %v526_v61 = vadd.f32 %v525_v56, %v524_v59  ;;  %v574_v56 = vstv %s573_s16 }
 0x16c   : > { %v527_v1 = vrot.slane %v526_v61, 4 }
 0x16e   : > { %v528_v5 = vadd.f32 %v527_v1, %v526_v61  ;;  %v583_v1 = vshrl.u32 %v346_v9, 7 }
 0x170   : > { %v529_v7 = vrot.slane %v528_v5, 2  ;;  %vm584_vm7 = vcmp.eq.s32.totalorder %v583_v1, 0 }
 0x171   : > { %vm586_vm11 = vmand %vm584_vm7, %vm585_vm8 }
 0x172   : > { %v530_v8 = vadd.f32 %v529_v7, %v528_v5  ;;  %vm594_vm12 = vmand %vm584_vm7, %vm593_vm9 }
 0x173   : > { %v761_v48 = vpop.f32.mrb[0].mxu0  ;;  %vm602_vm14 = vmand %vm584_vm7, %vm601_vm10 }
 0x174   : > { %vm478_vm5 = vcmp.gt.f32.partialorder %v761_v48, 0.5  ;;  %v468_v50 = vpop.f32.mrb[1].mxu0  ;;  %v531_v11 = vrot.slane %v530_v8, 1  ;;  %vm610_vm0 = vmand %vm584_vm7, %vm609_vm13 }
 0x175   : > { %vm477_vm6 = vcmp.gt.f32.partialorder %v468_v50, 0.5  ;;  %v484_v52 = vsel %vm478_vm5, %v753_v47, 1e+09  ;;  %v493_v2 = vsel %vm478_vm5, 1e+09, %v753_v47  ;;  %vm618_vm1 = vmand %vm584_vm7, %vm617_vm15 }
 0x176   : > { %v489_v53 = vsel %vm485_vm4, %v484_v52, inf  ;;  %v483_v55 = vsel %vm477_vm6, %v752_v49, 1e+09  ;;  %v492_v62 = vsel %vm477_vm6, 1e+09, %v752_v49  ;;  %v497_v4 = vsel %vm485_vm4, %v493_v2, inf }
 0x177   : > { %490 = vmin.xlane.f32.xlu1 %v489_v53  ;;  %v486_v60 = vsel %vm485_vm4, %v483_v55, inf  ;;  %v494_v0 = vsel %vm485_vm4, %v492_v62, inf  ;;  %v532_v12 = vadd.f32 %v531_v11, %v530_v8 }
 0x179   : > { %v533_v13 = vmul.f32 0.03125, %v532_v12 }
 0x17b   : > { %487 = vmin.xlane.f32.xlu1 %v486_v60 }
 0x17f   : > { %495 = vmin.xlane.f32.xlu1 %v494_v0 }
 0x183   : > { %498 = vmin.xlane.f32.xlu1 %v497_v4 }
 0x187   : > { %563 = vadd.xlane.f32.xlu1 %v562_v6 }
 0x198   : > { %597 = vperm.xlu1 %820, %v533_v13  }
 0x204   : > { %v491_v15 = vpop.xlane.xlu1 %490 }
 0x205   : > { %v510_v16 = vadd.f32 %v508_v14, %v491_v15 }
 0x207   : > { %512 = vst.msk [vmem:[#allocation3 + $0x8] sm:$0xff] %vm333_vm3, %v510_v16 }
 0x208   : > { %v488_v18 = vpop.xlane.xlu1 %487 }
 0x209   : > { %v509_v19 = vadd.f32 %v507_v17, %v488_v18 }
 0x20b   : > { %511 = vst.msk [vmem:[#allocation3] sm:$0xff] %vm333_vm3, %v509_v19 }
 0x20c   : > { %v496_v21 = vpop.xlane.xlu1 %495 }
 0x20d   : > { %v515_v22 = vadd.f32 %v513_v20, %v496_v21 }
 0x20e   : > { %v535_v25 = vld [vmem:[#allocation3 + $0x8] sm:$0xff] }
 0x20f   : > { %517 = vst.msk [vmem:[#allocation4] sm:$0xff] %vm333_vm3, %v515_v22  ;;  %v537_v29 = vsel %vm333_vm3, %v535_v25, 0.0 }
 0x210   : > { %v499_v24 = vpop.xlane.xlu1 %498 }
 0x211   : > { %v516_v26 = vadd.f32 %v514_v23, %v499_v24 }
 0x212   : > { %v534_v27 = vld [vmem:[#allocation3] sm:$0xff] }
 0x213   : > { %518 = vst.msk [vmem:[#allocation4 + $0x8] sm:$0xff] %vm333_vm3, %v516_v26  ;;  %v536_v28 = vsel %vm333_vm3, %v534_v27, 0.0 }
 0x214   : > { %v564_v30 = vpop.xlane.xlu1 %563  ;;  %v538_v31 = vadd.f32 %v537_v29, %v536_v28 }
 0x215   : > { %v565_v32 = vrot.slane %v564_v30, 4 }
 0x216   : > { %v539_v33 = vrot.slane %v538_v31, 4  ;;  %v546_v36 = vld [vmem:[#allocation4] sm:$0xff] }
 0x217   : > { %v566_v34 = vadd.f32 %v565_v32, %v564_v30  ;;  %v548_v40 = vsel %vm333_vm3, %v546_v36, 0.0 }
 0x218   : > { %v540_v35 = vadd.f32 %v539_v33, %v538_v31  ;;  %v598_v2 = vpop.permute.xlu1 %597 }
 0x219   : > { %v567_v37 = vrot.slane %v566_v34, 2 }
 0x21a   : > { %v541_v38 = vrot.slane %v540_v35, 2  ;;  %v547_v39 = vld [vmem:[#allocation4 + $0x8] sm:$0xff] }
 0x21b   : > { %v549_v41 = vsel %vm333_vm3, %v547_v39, 0.0  ;;  %v568_v44 = vadd.f32 %v567_v37, %v566_v34 }
 0x21c   : > { %v542_v42 = vadd.f32 %v541_v38, %v540_v35  ;;  %v550_v43 = vadd.f32 %v549_v41, %v548_v40 }
 0x21d   : > { %v569_v49 = vrot.slane %v568_v44, 1 }
 0x21e   : > { %v543_v45 = vrot.slane %v542_v42, 1  ;;  %v551_v46 = vrot.slane %v550_v43, 4 }
 0x21f   : > { %v570_v54 = vadd.f32 %v569_v49, %v568_v44 }
 0x220   : > { %v544_v47 = vadd.f32 %v543_v45, %v542_v42  ;;  %v552_v48 = vadd.f32 %v551_v46, %v550_v43 }
 0x221   : > { %v575_v59 = vmul.f32 %v574_v56, %v570_v54 }
 0x222   : > { %v545_v50 = vmul.f32 0.03125, %v544_v47  ;;  %v553_v51 = vrot.slane %v552_v48, 2 }
 0x223   : > { %v578_v62 = vmul.f32 0.0001, %v575_v59 }
 0x224   : > { %v576_v52 = vmul.f32 0.8, %v545_v50  ;;  %v554_v53 = vadd.f32 %v553_v51, %v552_v48 }
 0x226   : > { %605 = vperm.xlu1 %820, %v576_v52   ;;  %v555_v55 = vrot.slane %v554_v53, 1  ;;  %v579_v60 = vadd.f32 %v576_v52, %v533_v13 }
 0x228   : > { %v556_v57 = vadd.f32 %v555_v55, %v554_v53 }
 0x22a   : > { %v557_v58 = vmul.f32 0.03125, %v556_v57 }
 0x22c   : > { %v577_v61 = vmul.f32 -0.08, %v557_v58 }
 0x22e   : > { %v580_v63 = vadd.f32 %v579_v60, %v577_v61 }
 0x230   : > { %v581_v0 = vadd.f32 %v580_v63, %v578_v62 }
 0x232   : > { %589 = vperm.xlu0 %819, %v581_v0  }
 0x236   : > { %613 = vperm.xlu0 %819, %v577_v61  }
 0x2a5   : > { %v606_v4 = vpop.permute.xlu1 %605 }
 0x2b1   : > { %v590_v3 = vpop.permute.xlu0 %589 }
 0x2b2   : > { %v592_v9 = vsel %vm586_vm11, %v590_v3, 0.0 }
 0x2b3   : > { %v600_v5 = vsel %vm594_vm12, %v598_v2, %v592_v9 }
 0x2b4   : > { %v608_v6 = vsel %vm602_vm14, %v606_v4, %v600_v5 }
 0x2b5   : > { %v614_v7 = vpop.permute.xlu0 %613 }
 0x2b6   : > { %v616_v8 = vsel %vm610_vm0, %v614_v7, %v608_v6 }
 0x2b7   : > { %v619_v10 = vsel %vm618_vm1, %v578_v62, %v616_v8 }
 0x2b8   : > { %620 = vst [vmem:[%s304_s20] sm:$0xff] %v619_v10 }
 0x2b9   : > { %842 = shalt.err (!%p839_p6)
}
 0x2ba   : > { %s843_s15 = scalar_lea.hbm %s1084_s8, 128  ;;  %s847_s18 = scalar_lea.hbm %s1137_s6, 256 }
 0x2bb   : > { %p844_p7 = scmp.ne.s32.totalorder %s1084_s8, %s843_s15  ;;  %p848_p11 = scmp.lt.u32.totalorder %s1084_s8, %s1137_s6 }
 0x2bc   : > { %p849_p12 = scmp.lt.u32.totalorder %s847_s18, %s843_s15  ;;  %p851_p0 = scmp.lt.u32.totalorder %s843_s15, %s1084_s8 }
 0x2bd   : > { %p845_p9 = pnand %p844_p7, %p987_p4 }
 0x2be   : > { %p850_p13 = por %p849_p12, %p848_p11 }
 0x2bf   : > { %p846_p10 = pneg %p845_p9 }
 0x2c0   : > { %p852_p1 = por %p851_p0, %p850_p13 }
 0x2c2   : > { %p853_p2 = pnand %p852_p1, %p846_p10 }
 0x2c4   : > { %856 = shalt.err (!%p853_p2)
}
 0x2c5   : > { %762 = dma.vmem_to_hbm [thread:$0]  (%p987_p4), %s1086_s27, 128, %s1084_s8, %s622_s24  }
 0x2c6 PF: > { %p768_p3 = scmp.ge.s32.totalorder %s907_s26, 2  ;;  %s647_s28 = sand.u32 1, %s887_s21  }
 0x2c7   : > { %s648_s30 = scalar_lea.sflag [#allocation6], %s647_s28 }
 0x2c8   : > { %p765_p5 = pnand %p768_p3, %p994_p8 }
 0x2ca   : > { %882 = dma.done.wait (!%p765_p5), %s648_s30, 128  }
 0x2cb   : > { %884 = vsyncadd (!%p765_p5), %s648_s30, 4294967168  ;;  %s19_s26 = sadd.s32 1, %s907_s26   ;;  %s1140_s21 = smov %s891_s22 }
 0x2cc   : > { %p16_p6 = scmp.ge.s32.totalorder %s19_s26, 4   ;;  %s1141_s22 = smov %s895_s23 }
 0x2cd   : > { %s1142_s23 = smov %s1000_s10  ;;  %s1143_s24 = smov %s903_s25 }
 0x2ce   : > { %s1144_s25 = smov %s1146_s29  ;;  %18 = sbr.rel (!%p16_p6) target bundleno = 4 (0x4), region = 93 }
 0x2d5   :  { %653 = vsyncpa [#allocation6], 1 }
 0x2d6   :  { %655 = vsyncpa [#allocation6 + $0x1], 1 }

</bundles_post_ra>
